<compile_context>
chip_gen: v7x
topology: tpu7x:2x2x1
jax: 0.10.0
libtpu: 0.0.40
codegen_flags: <defaults>
</compile_context>

<pallas_src>
import functools
import math

import jax
import jax.numpy as jnp
from jax.experimental import pallas as pl
from jax.experimental.pallas import tpu as pltpu

_LANE = 128      # vreg lane width
_SUBLANE = 8     # vreg sublane count (32-bit)
_LN_EPS = 1e-5   # torch nn.LayerNorm default


# ---------------------------------------------------------------------------
# Positional-encoding table (parameter setup, plain JAX)
# ---------------------------------------------------------------------------
def make_positional_encoding_table(d_model, max_len=5000, dtype=jnp.float32):
    """Sinusoidal PE table, shape (max_len, d_model) — matches the torch buffer."""
    position = jnp.arange(0, max_len, dtype=jnp.float32)[:, None]            # (L, 1)
    div_term = jnp.exp(
        jnp.arange(0, d_model, 2, dtype=jnp.float32) * (-math.log(10000.0) / d_model)
    )                                                                         # (D/2,)
    angles = position * div_term                                              # (L, D/2)
    pe = jnp.zeros((max_len, d_model), dtype=jnp.float32)
    pe = pe.at[:, 0::2].set(jnp.sin(angles))
    pe = pe.at[:, 1::2].set(jnp.cos(angles))
    return pe.astype(dtype)


# ---------------------------------------------------------------------------
# Kernel 1: fused embedding-scale + positional-encoding add
# ---------------------------------------------------------------------------
def _scale_add_pe_kernel(x_ref, pe_ref, o_ref, *, scale):
    # x_ref / pe_ref / o_ref are (1, TILE_S, D') blocks.  The pe block's index
    # does not change along the innermost (batch) grid axis, so Pallas keeps
    # it resident in VMEM across the batch.
    o_ref[...] = x_ref[...] * scale + pe_ref[...]
    # TODO(synk): nn.Dropout after the add is identity in eval mode.


def _plan_layout(S, D):
    """Return (S', D') for a lane-dense view of the (S, D) trailing dims."""
    if D % _LANE == 0:
        return S, D
    k = _LANE // math.gcd(D, _LANE)          # smallest k with (k*D) % 128 == 0
    if k > 1 and S % k == 0:
        return S // k, D * k
    return S, D                               # D == full dim is still legal


def _choose_tile_s(S2, D2, itemsize, tile_bytes):
    """Pick a sublane-aligned seq-tile that divides S2 and targets tile_bytes."""
    rows = max(1, tile_bytes // (D2 * itemsize))
    if rows >= S2:
        return S2
    tile_s = max(_SUBLANE, (rows // _SUBLANE) * _SUBLANE)
    tile_s = min(tile_s, S2)
    while tile_s > _SUBLANE and S2 % tile_s != 0:
        tile_s -= _SUBLANE
    if S2 % tile_s != 0:
        tile_s = S2
    return tile_s


def embed_scale_pe(x, pe_table, *, scale, tile_bytes=2 * 1024 * 1024):
    """x: (B, S, D) embeddings. Returns x * scale + pe[:S] via a tiled Pallas kernel."""
    B, S, D = x.shape
    itemsize = jnp.dtype(x.dtype).itemsize
    pe_slice = pe_table[:S, :].astype(x.dtype)

    S2, D2 = _plan_layout(S, D)               # lane-dense folded view
    tile_s = _choose_tile_s(S2, D2, itemsize, tile_bytes)
    x_in = x.reshape(B, S2, D2)
    pe_in = pe_slice.reshape(1, S2, D2)

    grid = (S2 // tile_s, B)                  # batch innermost -> pe block resident
    block = (1, tile_s, D2)

    def x_map(t, b):
        return (b, t, 0)

    def pe_map(t, b):
        return (0, t, 0)

    block_bytes = tile_s * D2 * itemsize
    vmem_limit = int(min(max(8 * block_bytes, 8 * 1024 * 1024), 64 * 1024 * 1024))

    out = pl.pallas_call(
        functools.partial(_scale_add_pe_kernel, scale=float(scale)),
        out_shape=jax.ShapeDtypeStruct((B, S2, D2), x.dtype),
        grid_spec=pl.GridSpec(
            grid=grid,
            in_specs=[pl.BlockSpec(block, x_map),
                      pl.BlockSpec(block, pe_map)],
            out_specs=pl.BlockSpec(block, x_map),
        ),
        compiler_params=pltpu.CompilerParams(
            dimension_semantics=("parallel", "parallel"),
            vmem_limit_bytes=vmem_limit,
        ),
        cost_estimate=pl.CostEstimate(
            flops=2 * B * S * D,
            transcendentals=0,
            bytes_accessed=2 * B * S * D * itemsize + S * D * itemsize,
        ),
    )(x_in, pe_in)
    return out.reshape(B, S, D)


# ---------------------------------------------------------------------------
# Kernel 2: fully fused TransformerEncoderLayer (per batch element)
# ---------------------------------------------------------------------------
def _layer_norm(h, gamma, beta):
    mu = jnp.mean(h, axis=-1, keepdims=True)
    var = jnp.mean(jnp.square(h - mu), axis=-1, keepdims=True)
    return (h - mu) * jax.lax.rsqrt(var + _LN_EPS) * gamma + beta


def _encoder_layer_kernel(x_ref,
                          wq_ref, bq_ref, wk_ref, bk_ref, wv_ref, bv_ref,
                          wo_ref, bo_ref, g1_ref, be1_ref,
                          w1_ref, b1_ref, w2_ref, b2_ref, g2_ref, be2_ref,
                          o_ref, *, attn_scale):
    x = x_ref[0].astype(jnp.float32)                                         # (S, D)

    # SimplifiedAttention (single full-width head; nhead only enters the scale).
    q = jnp.dot(x, wq_ref[...], preferred_element_type=jnp.float32) + bq_ref[...]
    k = jnp.dot(x, wk_ref[...], preferred_element_type=jnp.float32) + bk_ref[...]
    v = jnp.dot(x, wv_ref[...], preferred_element_type=jnp.float32) + bv_ref[...]
    s = jax.lax.dot_general(q, k, (((1,), (1,)), ((), ())),
                            preferred_element_type=jnp.float32) * attn_scale  # (S, S)
    s = s - jnp.max(s, axis=-1, keepdims=True)
    p = jnp.exp(s)
    p = p / jnp.sum(p, axis=-1, keepdims=True)
    attn = jnp.dot(p, v, preferred_element_type=jnp.float32)
    attn = jnp.dot(attn, wo_ref[...], preferred_element_type=jnp.float32) + bo_ref[...]

    # TODO(synk): dropout1 / dropout2 / FFN dropout are identity in eval mode.
    h = _layer_norm(x + attn, g1_ref[...], be1_ref[...])

    f = jnp.maximum(
        jnp.dot(h, w1_ref[...], preferred_element_type=jnp.float32) + b1_ref[...], 0.0)
    f = jnp.dot(f, w2_ref[...], preferred_element_type=jnp.float32) + b2_ref[...]
    h = _layer_norm(h + f, g2_ref[...], be2_ref[...])

    o_ref[0] = h.astype(o_ref.dtype)


def _full_spec(arr):
    nd = arr.ndim
    return pl.BlockSpec(arr.shape, lambda b, _nd=nd: (0,) * _nd)


def encoder_layer_forward(x, lp, *, nhead):
    B, S, D = x.shape
    attn_scale = 1.0 / math.sqrt(D / nhead)

    weights = [lp["wq"], lp["bq"], lp["wk"], lp["bk"], lp["wv"], lp["bv"],
               lp["wo"], lp["bo"], lp["g1"], lp["be1"],
               lp["w1"], lp["b1"], lp["w2"], lp["b2"], lp["g2"], lp["be2"]]

    in_specs = [pl.BlockSpec((1, S, D), lambda b: (b, 0, 0))]
    in_specs += [_full_spec(w) for w in weights]

    return pl.pallas_call(
        functools.partial(_encoder_layer_kernel, attn_scale=float(attn_scale)),
        out_shape=jax.ShapeDtypeStruct((B, S, D), x.dtype),
        grid_spec=pl.GridSpec(
            grid=(B,),
            in_specs=in_specs,
            out_specs=pl.BlockSpec((1, S, D), lambda b: (b, 0, 0)),
        ),
        compiler_params=pltpu.CompilerParams(dimension_semantics=("parallel",)),
    )(x, *weights)


# ---------------------------------------------------------------------------
# Kernel 3: fc_out (matmul + bias)
# ---------------------------------------------------------------------------
def _linear_kernel(x_ref, w_ref, b_ref, o_ref):
    y = jnp.dot(x_ref[0], w_ref[...], preferred_element_type=jnp.float32) + b_ref[...]
    o_ref[0] = y.astype(o_ref.dtype)


def linear_forward(x, w, b):
    B, S, D = x.shape
    V = w.shape[1]
    return pl.pallas_call(
        _linear_kernel,
        out_shape=jax.ShapeDtypeStruct((B, S, V), x.dtype),
        grid_spec=pl.GridSpec(
            grid=(B,),
            in_specs=[pl.BlockSpec((1, S, D), lambda bb: (bb, 0, 0)),
                      _full_spec(w),
                      _full_spec(b)],
            out_specs=pl.BlockSpec((1, S, V), lambda bb: (bb, 0, 0)),
        ),
        compiler_params=pltpu.CompilerParams(dimension_semantics=("parallel",)),
    )(x, w, b)


# ---------------------------------------------------------------------------
# Parameter init + full forward
# ---------------------------------------------------------------------------
def _normal(key, shape, std, dtype):
    return (jax.random.normal(key, shape, jnp.float32) * std).astype(dtype)


def init_transformer_params(key, *, src_vocab, tgt_vocab, d_model, num_layers,
                            dim_ff, max_len=5000, dtype=jnp.float32):
    kidx = iter(range(1000))

    def nk():
        return jax.random.fold_in(key, next(kidx))

    params = {
        "src_emb": _normal(nk(), (src_vocab, d_model), 0.02, dtype),
        "tgt_emb": _normal(nk(), (tgt_vocab, d_model), 0.02, dtype),   # unused by forward
        "pe": make_positional_encoding_table(d_model, max_len, dtype),
        "w_out": _normal(nk(), (d_model, tgt_vocab), 1.0 / math.sqrt(d_model), dtype),
        "b_out": _normal(nk(), (1, tgt_vocab), 0.02, dtype),
    }
    layers = []
    for _ in range(num_layers):
        std_d = 1.0 / math.sqrt(d_model)
        std_f = 1.0 / math.sqrt(dim_ff)
        layers.append(dict(
            wq=_normal(nk(), (d_model, d_model), std_d, dtype), bq=_normal(nk(), (1, d_model), 0.02, dtype),
            wk=_normal(nk(), (d_model, d_model), std_d, dtype), bk=_normal(nk(), (1, d_model), 0.02, dtype),
            wv=_normal(nk(), (d_model, d_model), std_d, dtype), bv=_normal(nk(), (1, d_model), 0.02, dtype),
            wo=_normal(nk(), (d_model, d_model), std_d, dtype), bo=_normal(nk(), (1, d_model), 0.02, dtype),
            w1=_normal(nk(), (d_model, dim_ff), std_d, dtype), b1=_normal(nk(), (1, dim_ff), 0.02, dtype),
            w2=_normal(nk(), (dim_ff, d_model), std_f, dtype), b2=_normal(nk(), (1, d_model), 0.02, dtype),
            g1=jnp.ones((1, d_model), dtype), be1=jnp.zeros((1, d_model), dtype),
            g2=jnp.ones((1, d_model), dtype), be2=jnp.zeros((1, d_model), dtype),
        ))
    params["layers"] = layers
    return params


def transformer_forward(params, src_tokens, tgt_tokens=None, *, nhead):
    """Eval-mode forward of the reference Transformer. `tgt_tokens` is unused
    by the reference forward (kept for signature parity)."""
    B, S = src_tokens.shape
    # TODO(synk): embedding gather stays in plain JAX (XLA gather).
    x = params["src_emb"][src_tokens]                                   # (B, S, D)
    # Matches torch exactly: `src * math.sqrt(src.size(-1))` where `src` on the
    # RHS is still the *token* tensor, so the scale is sqrt(seq_len).
    emb_scale = math.sqrt(float(src_tokens.shape[-1]))
    x = embed_scale_pe(x, params["pe"], scale=emb_scale)
    for lp in params["layers"]:
        x = encoder_layer_forward(x, lp, nhead=nhead)
    return linear_forward(x, params["w_out"], params["b_out"])


# ---------------------------------------------------------------------------
# Pure-JAX reference (for correctness check)
# ---------------------------------------------------------------------------
def _ln_ref(h, g, b):
    mu = jnp.mean(h, -1, keepdims=True)
    var = jnp.mean((h - mu) ** 2, -1, keepdims=True)
    return (h - mu) / jnp.sqrt(var + _LN_EPS) * g + b


def transformer_reference(params, src_tokens, *, nhead):
    B, S = src_tokens.shape
    D = params["src_emb"].shape[1]
    x = params["src_emb"][src_tokens] * math.sqrt(float(src_tokens.shape[-1]))
    x = x + params["pe"][None, :S, :]
    for lp in params["layers"]:
        q = x @ lp["wq"] + lp["bq"]
        k = x @ lp["wk"] + lp["bk"]
        v = x @ lp["wv"] + lp["bv"]
        s = jnp.einsum("bqd,bkd->bqk", q, k) / math.sqrt(D / nhead)
        p = jax.nn.softmax(s, axis=-1)
        a = jnp.einsum("bqk,bkd->bqd", p, v) @ lp["wo"] + lp["bo"]
        x = _ln_ref(x + a, lp["g1"], lp["be1"])
        f = jnp.maximum(x @ lp["w1"] + lp["b1"], 0.0) @ lp["w2"] + lp["b2"]
        x = _ln_ref(x + f, lp["g2"], lp["be2"])
    return x @ params["w_out"] + params["b_out"]


# ---------------------------------------------------------------------------
# Main
# ---------------------------------------------------------------------------
if __name__ == "__main__":
    B, S = 2, 8
    d_model, nhead, num_layers, dim_ff = 32, 4, 2, 64
    src_vocab = tgt_vocab = 128

    root = jax.random.PRNGKey(0)
    pkey, skey, tkey = jax.random.split(root, 3)
    params = init_transformer_params(
        pkey, src_vocab=src_vocab, tgt_vocab=tgt_vocab, d_model=d_model,
        num_layers=num_layers, dim_ff=dim_ff, max_len=64)

    src = jax.random.randint(skey, (B, S), 0, src_vocab, dtype=jnp.int32)
    tgt = jax.random.randint(tkey, (B, S), 0, tgt_vocab, dtype=jnp.int32)

    out = jax.block_until_ready(transformer_forward(params, src, tgt, nhead=nhead))
    assert out.shape == (B, S, tgt_vocab)
    assert bool(jnp.all(jnp.isfinite(out)))

    ref = transformer_reference(params, src, nhead=nhead)
    max_err = float(jnp.max(jnp.abs(out - ref)))
    assert jnp.allclose(out, ref, atol=2e-4, rtol=2e-4), f"max abs err {max_err}"

    print("KERNEL_OK")
</pallas_src>

<mosaic_0001>
module attributes {stable_mosaic.version = 11 : i64} {
  func.func @_scale_add_pe_kernel(%arg0: i32, %arg1: i32, %arg2: memref<1x2x128xf32, #tpu.memory_space<vmem>>, %arg3: memref<1x2x128xf32, #tpu.memory_space<vmem>>, %arg4: memref<1x2x128xf32, #tpu.memory_space<vmem>>) attributes {dimension_semantics = [#tpu.dimension_semantics<parallel>, #tpu.dimension_semantics<parallel>], iteration_bounds = array<i64: 1, 2>, scalar_prefetch = 0 : i64, scratch_operands = 0 : i64, tpu.core_type = #tpu.core_type<tc>, window_params = [{transform_indices = @transform_0, window_bounds = array<i64: 1, 2, 128>}, {transform_indices = @transform_1, window_bounds = array<i64: 1, 2, 128>}, {transform_indices = @transform_2, window_bounds = array<i64: 1, 2, 128>}]} {
    %c0 = arith.constant 0 : index
    %c0_0 = arith.constant 0 : index
    %c0_1 = arith.constant 0 : index
    %0 = vector.load %arg2[%c0, %c0_0, %c0_1] : memref<1x2x128xf32, #tpu.memory_space<vmem>>, vector<1x2x128xf32>
    %cst = arith.constant 2.82842708 : f32
    %1 = vector.broadcast %cst : f32 to vector<1x2x128xf32>
    %2 = arith.mulf %0, %1 : vector<1x2x128xf32>
    %c0_2 = arith.constant 0 : index
    %c0_3 = arith.constant 0 : index
    %c0_4 = arith.constant 0 : index
    %3 = vector.load %arg3[%c0_2, %c0_3, %c0_4] : memref<1x2x128xf32, #tpu.memory_space<vmem>>, vector<1x2x128xf32>
    %4 = arith.addf %2, %3 : vector<1x2x128xf32>
    %c0_5 = arith.constant 0 : index
    %c0_6 = arith.constant 0 : index
    %c0_7 = arith.constant 0 : index
    %5 = vector.load %arg4[%c0_5, %c0_6, %c0_7] : memref<1x2x128xf32, #tpu.memory_space<vmem>>, vector<1x2x128xf32>
    tpu.vector_store %arg4[%c0_5, %c0_6, %c0_7], %4 {strides = array<i32>} : memref<1x2x128xf32, #tpu.memory_space<vmem>>, vector<1x2x128xf32>,
    return
  }
  func.func @transform_0(%arg0: i32, %arg1: i32) -> (i32, i32, i32) {
    %c0_i32 = arith.constant 0 : i32
    %c0_i32_0 = arith.constant 0 : i32
    return %arg1, %arg0, %c0_i32 : i32, i32, i32
  }
  func.func @transform_1(%arg0: i32, %arg1: i32) -> (i32, i32, i32) {
    %c0_i32 = arith.constant 0 : i32
    %c0_i32_0 = arith.constant 0 : i32
    %c0_i32_1 = arith.constant 0 : i32
    return %c0_i32, %arg0, %c0_i32_0 : i32, i32, i32
  }
  func.func @transform_2(%arg0: i32, %arg1: i32) -> (i32, i32, i32) {
    %c0_i32 = arith.constant 0 : i32
    %c0_i32_0 = arith.constant 0 : i32
    return %arg1, %arg0, %c0_i32 : i32, i32, i32
  }
}

</mosaic_0001>

<bundles_post_ra>
// kernel: tpu_custom_call.1
= control target key start
LH: loop header
LB: loop body
LE: loop exit
PB: predicated region body
PF: predicated region fallthrough
CT: control target
= control target key end

     0   :  { %7 = vsyncpa [#allocation3], 0  ;;  %s690_s0 = inlined_call_operand.hbm [shape: f32[2,2,128], index: 0, kind: input, shape index: {}]   ;;  %s691_s1 = inlined_call_operand.vmem [shape: f32[1,2,128], index: 1, kind: input, shape index: {}]   ;;  %s692_s2 = inlined_call_operand.hbm [shape: f32[2,2,128], index: 2, kind: output, shape index: {}]  }
   0x1   :  { %9 = vsyncpa [#allocation3 + $0x1], 0 }
   0x2   :  { %10 = vsyncpa [#allocation4], 0 }
   0x3   :  { %12 = vsyncpa [#allocation4 + $0x1], 0  ;;  %s515_s9 = smov 0   ;;  %s517_s10 = smov 0  }
   0x4   :  { %s519_s11 = smov 0   ;;  %s521_s12 = smov 0  }
   0x5   :  { %s523_s13 = smov 0   ;;  %s525_s14 = smov 0  }
   0x6 LB: > { %s308_s15 = sadd.s32 4294967295, %s496_s14   ;;  %s309_s16 = sadd.s32 4294967294, %s496_s14   ;;  %s496_s14 = sphi %s525_s14, %s18_s14   ;;  %s492_s13 = sphi %s523_s13, %s708_s13   ;;  %s488_s12 = sphi %s521_s12, %s707_s12   ;;  %s484_s11 = sphi %s519_s11, %s706_s11   ;;  %s480_s10 = sphi %s517_s10, %s705_s10   ;;  %s476_s9 = sphi %s515_s9, %s704_s9  }
   0x7   : > { %s27_s17 = sadd.s32 1, %s492_s13  ;;  %s39_s18 = sadd.s32 1, %s484_s11 }
   0x8   : > { %p28_p0 = scmp.ge.s32.totalorder %s27_s17, 2  ;;  %p46_p1 = scmp.ne.s32.totalorder %s484_s11, %s480_s10 }
   0x9   : > { %p47_p2 = scmp.eq.s32.totalorder %s496_s14, 0  ;;  %p52_p3 = scmp.ne.s32.totalorder %s480_s10, %s476_s9 }
   0xa   : > { %s710_s17 = smov (%p28_p0, %s27_s17), 0  ;;  %p53_p5 = scmp.eq.s32.totalorder %s308_s15, 0 }
   0xb   : > { %p556_p4 = por %p47_p2, %p46_p1  ;;  %s34_s20 = ssub.s32 %s492_s13, %s710_s17 }
   0xc   : > { %p104_p6 = scmp.eq.s32.totalorder %s308_s15, 1  ;;  %p37_p7 = scmp.eq.s32.totalorder %s34_s20, 0 }
   0xd   : > { %p562_p8 = por %p53_p5, %p52_p3  ;;  %p110_p10 = scmp.eq.s32.totalorder %s309_s16, 1 }
   0xe   : > { %p566_p9 = por %p104_p6, %p46_p1  ;;  %p334_p13 = scmp.lt.s32.totalorder %s496_s14, 2 }
   0xf   : > { %s571_s23 = scalar_select %p37_p7, %s484_s11, %s39_s18  }
  0x10   : > { %s696_s22 = scalar_select %p566_p9, 1, 0 }
  0x11   : > { %p573_p11 = por %p110_p10, %p52_p3  ;;  %s137_s25 = sand.u32 1, %s484_s11  }
  0x12   : > { %s313_s26 = sshll.u32 %s137_s25, 1  ;;  %s314_s27 = sshll.u32 %s492_s13, 5 }
  0x13   : > { %s697_s24 = scalar_select %p573_p11, 1, 0 }
  0x14   : > { %s584_s30 = scalar_lea.hbm %s690_s0, %s314_s27  ;;  %s141_s3 = scalar_lea.vmem [#allocation2], %s313_s26 }
  0x15   : > { %s149_s4 = sshll.u32 %s141_s3, 4  ;;  %p590_p0 = pnand %p334_p13, %p556_p4  ;;  %s586_s4 = int_to_ptr.vmem [resolvable:$true] %s149_s4 }
  0x16   : > { %s138_s6 = scalar_lea.sflag [#allocation3], %s137_s25  ;;  %s384_s7 = scalar_lea.hbm %s584_s30, 32 }
  0x17   : > { %p385_p3 = scmp.ne.s32.totalorder %s584_s30, %s384_s7  ;;  %p386_p5 = pneg %p590_p0 }
  0x18   : > { %s389_s16 = scalar_lea.hbm %s690_s0, 64  ;;  %p390_p4 = scmp.lt.u32.totalorder %s584_s30, %s690_s0 }
  0x19   : > { %p387_p6 = pnand %p386_p5, %p385_p3  ;;  %p391_p10 = scmp.lt.u32.totalorder %s389_s16, %s384_s7 }
  0x1a   : > { %p393_p12 = scmp.lt.u32.totalorder %s384_s7, %s584_s30 }
  0x1b   : > { %p388_p7 = pneg %p387_p6  ;;  %p392_p13 = por %p391_p10, %p390_p4 }
  0x1d   : > { %p394_p1 = por %p393_p12, %p392_p13 }
  0x1f   : > { %p395_p2 = pnand %p394_p1, %p388_p7 }
  0x21   : > { %398 = shalt.err (!%p395_p2)
}
  0x22   : > { %s399_s20 = scalar_lea.vmem %s586_s4, 32  ;;  %s498_s25 = smov [#allocation2]  }
  0x23   : > { %p400_p3 = scmp.ne.s32.totalorder %s586_s4, %s399_s20  ;;  %s404_s26 = sshll.u32 %s498_s25, 4  ;;  %s405_s26 = int_to_ptr.vmem [resolvable:$false] %s404_s26 }
  0x24   : > { %s406_s27 = scalar_lea.vmem %s405_s26, 64  ;;  %p407_p9 = scmp.lt.s32.totalorder %s586_s4, %s405_s26 }
  0x25   : > { %p402_p6 = pnand %p400_p3, %p386_p5  ;;  %p408_p4 = scmp.lt.s32.totalorder %s406_s27, %s399_s20 }
  0x27   : > { %p403_p11 = pneg %p402_p6  ;;  %p409_p10 = por %p408_p4, %p407_p9 }
  0x29   : > { %p410_p12 = pnand %p409_p10, %p403_p11 }
  0x2b   : > { %413 = shalt.err (!%p410_p12)
}
  0x2c   : > { %329 = dma.hbm_to_vmem [thread:$0]  (!%p590_p0), %s584_s30, 32, %s586_s4, %s138_s6  }
  0x2d   : > { %p699_p1 = scmp.lt.s32.totalorder %s496_s14, 3  ;;  %p700_p2 = scmp.ge.s32.totalorder %s496_s14, 1 }
  0x2f   : > { %p155_p5 = pnand %p700_p2, %p699_p1 }
  0x30   : > { %s626_s28 = sand.u32 (!%p155_p5), 1, %s480_s10  }
  0x31   : > { %158 = sbr.rel (%p155_p5) target bundleno = 83 (0x53), region = 28  ;;  %s316_s29 = sshll.u32 (!%p155_p5), %s626_s28, 1 }
  0x32   : > { %s161_s3 = scalar_lea.sflag (!%p155_p5), [#allocation3], %s626_s28  ;;  %s164_s7 = scalar_lea.vmem (!%p155_p5), [#allocation2], %s316_s29 }
  0x38   : > { %467 = dma.done.wait (%p562_p8), %s161_s3, 32  }
  0x39   : > { %469 = vsyncadd (%p562_p8), %s161_s3, 4294967264  ;;  %v193_v0 = vld [vmem:[%s164_s7] sm:$0x3]  ;;  %s188_s5 = scalar_lea.vmem [#allocation5], %s316_s29  ;;  %s319_s8 = sshll.u32 %s488_s12, 5 }
  0x3a   : > { %v195_v1 = vld [vmem:[%s691_s1] sm:$0x3]  ;;  %s213_s6 = sshll.u32 %s188_s5, 4  ;;  %v194_v2 = vmul.f32 2.828427, %v193_v0  ;;  %s643_s21 = scalar_lea.hbm %s692_s2, %s319_s8  ;;  %s638_s6 = int_to_ptr.vmem [resolvable:$true] %s213_s6 }
  0x3b   : > { %s199_s18 = scalar_lea.sflag [#allocation4], %s626_s28  ;;  %s414_s19 = scalar_lea.vmem %s638_s6, 32 }
  0x3c   : > { %v196_v3 = vadd.f32 %v195_v1, %v194_v2  ;;  %p415_p8 = scmp.ne.s32.totalorder %s638_s6, %s414_s19  ;;  %p701_p9 = scmp.ne.s32.totalorder %s696_s22, 0 }
  0x3d   : > { %s499_s12 = smov [#allocation5]  }
  0x3e   : > { %197 = vst [vmem:[%s188_s5] sm:$0x3] %v196_v3  ;;  %p416_p11 = pnand %p415_p8, %p701_p9  ;;  %s418_s20 = sshll.u32 %s499_s12, 4  ;;  %s419_s20 = int_to_ptr.vmem [resolvable:$false] %s418_s20 }
  0x3f   : > { %s420_s25 = scalar_lea.vmem %s419_s20, 64  ;;  %p421_p7 = scmp.lt.s32.totalorder %s638_s6, %s419_s20 }
  0x40   : > { %p417_p0 = pneg %p416_p11  ;;  %p422_p13 = scmp.lt.s32.totalorder %s420_s25, %s414_s19 }
  0x42   : > { %p423_p3 = por %p422_p13, %p421_p7 }
  0x44   : > { %p424_p6 = pnand %p423_p3, %p417_p0 }
  0x46   : > { %427 = shalt.err (!%p424_p6)
}
  0x47   : > { %s428_s26 = scalar_lea.hbm %s643_s21, 32  ;;  %s432_s29 = scalar_lea.hbm %s692_s2, 64 }
  0x48   : > { %p429_p4 = scmp.ne.s32.totalorder %s643_s21, %s428_s26  ;;  %p433_p1 = scmp.lt.u32.totalorder %s643_s21, %s692_s2 }
  0x49   : > { %p434_p2 = scmp.lt.u32.totalorder %s432_s29, %s428_s26  ;;  %p436_p8 = scmp.lt.u32.totalorder %s428_s26, %s643_s21 }
  0x4a   : > { %p430_p10 = pnand %p429_p4, %p701_p9 }
  0x4b   : > { %p435_p5 = por %p434_p2, %p433_p1 }
  0x4c   : > { %p431_p12 = pneg %p430_p10 }
  0x4d   : > { %p437_p11 = por %p436_p8, %p435_p5 }
  0x4f   : > { %p438_p0 = pnand %p437_p11, %p431_p12 }
  0x51   : > { %441 = shalt.err (!%p438_p0)
}
  0x52   : > { %324 = dma.vmem_to_hbm [thread:$0]  (%p701_p9), %s638_s6, 32, %s643_s21, %s199_s18  }
  0x53 PF: > { %s225_s30 = sand.u32 1, %s476_s9   ;;  %p702_p7 = scmp.ne.s32.totalorder %s697_s24, 0 }
  0x54   : > { %p703_p13 = scmp.ge.s32.totalorder %s496_s14, 2  ;;  %s226_s4 = scalar_lea.sflag [#allocation4], %s225_s30 }
  0x56   : > { %p331_p3 = pnand %p703_p13, %p702_p7 }
  0x58   : > { %471 = dma.done.wait (!%p331_p3), %s226_s4, 32  }
  0x59   : > { %473 = vsyncadd (!%p331_p3), %s226_s4, 4294967264  ;;  %s18_s14 = sadd.s32 1, %s496_s14   ;;  %s704_s9 = smov %s480_s10 }
  0x5a   : > { %p15_p6 = scmp.ge.s32.totalorder %s18_s14, 4   ;;  %s705_s10 = smov %s484_s11 }
  0x5b   : > { %s706_s11 = smov %s571_s23  ;;  %s707_s12 = smov %s492_s13 }
  0x5c   : > { %s708_s13 = smov %s710_s17  ;;  %17 = sbr.rel (!%p15_p6) target bundleno = 6 (0x6), region = 76 }
  0x63   :  { %231 = vsyncpa [#allocation3], 1 }
  0x64   :  { %233 = vsyncpa [#allocation3 + $0x1], 1 }
  0x65   :  { %234 = vsyncpa [#allocation4], 1 }
  0x66   :  { %236 = vsyncpa [#allocation4 + $0x1], 1 }

</bundles_post_ra>
